<compile_context>
chip_gen: v5e
topology: v5e:2x2
jax: 0.10.0
libtpu: 0.0.40
codegen_flags: <defaults>
</compile_context>

<pallas_src>
import jax
import jax.numpy as jnp
from jax.experimental import pallas as pl
from jax.experimental.pallas import tpu as pltpu

PACK = 32                      # batch rows packed per lane-row
IN_F, HID, OUT_F = 3, 4, 4
IN_LANES = PACK * IN_F         # 96
OUT_LANES = PACK * OUT_F       # 128


def _round_up(n, m):
    return ((n + m - 1) // m) * m


def _is_v5e():
    try:
        kind = jax.devices()[0].device_kind.lower()
    except Exception:
        return False
    return ("v5 lite" in kind) or ("v5litepod" in kind) or ("v5e" in kind)


def _matmul_dtype(io_dtype):
    """MXU operand dtype. bf16 if requested; forced bf16 on v5e where f32
    matmul is multi-pass emulated and would become co-critical."""
    if jax.dtypes.canonicalize_dtype(io_dtype) == jnp.bfloat16:
        return jnp.bfloat16
    return jnp.bfloat16 if _is_v5e() else jnp.float32


def mlp_kernel(x_ref, w1_ref, b1_ref, w2_ref, b2_ref, o_ref):
    # x_ref : (TR, 96)   TR packed rows (32 batch rows x 3 features each)
    # w1_ref: (96, 128)  block-diagonal: 32 copies of W1^T   (resident)
    # b1_ref: (1, 128)   fc1 bias tiled 32x (f32, resident)
    # w2_ref: (128, 128) block-diagonal: 32 copies of W2^T   (resident)
    # b2_ref: (1, 128)   fc2 bias tiled 32x (f32, resident)
    # o_ref : (TR, 128)  packed output (lane-dense, unmasked stores)
    x = x_ref[...].astype(w1_ref.dtype)                        # free VPU cast
    h = jnp.dot(x, w1_ref[...], preferred_element_type=jnp.float32) + b1_ref[...]
    h = jnp.maximum(h, 0.0)                                    # ReLU (VPU)
    y = jnp.dot(h.astype(w2_ref.dtype), w2_ref[...],
                preferred_element_type=jnp.float32) + b2_ref[...]
    o_ref[...] = y.astype(o_ref.dtype)


def neural_net_forward(x, w1, b1, w2, b2, *, block_rows=2048, io_dtype=jnp.float32):
    """Forward pass of NeuralNet: fc1 -> ReLU -> fc2.

    x  : (B, 3) float32
    w1 : (4, 3) float32 (PyTorch fc1.weight layout: out x in)
    b1 : (4,)   float32
    w2 : (4, 4) float32 (PyTorch fc2.weight layout: out x in)
    b2 : (4,)   float32
    returns (B, 4) in io_dtype.

    block_rows: packed-row tile size (rounded up to a multiple of 8).
                2048 packed rows = 64K batch rows ~= 1.8 MiB/step double
                buffered -> safe on every TPU generation, few grid steps.
    io_dtype:   jnp.bfloat16 halves streamed HBM bytes (accumulation stays
                f32); results then match the f32 reference only to ~1e-2.
    """
    B = x.shape[0]
    io_dtype = jax.dtypes.canonicalize_dtype(io_dtype)
    mxu_dtype = _matmul_dtype(io_dtype)
    block_rows = max(8, _round_up(int(block_rows), 8))

    # Tiny replicated weights/biases (a few KiB; built once per call).
    w1_t = jnp.asarray(w1, jnp.float32).T                      # (3, 4)
    w2_t = jnp.asarray(w2, jnp.float32).T                      # (4, 4)
    eye = jnp.eye(PACK, dtype=jnp.float32)
    w1_bd = jnp.kron(eye, w1_t).astype(mxu_dtype)              # (96, 128)
    w2_bd = jnp.kron(eye, w2_t).astype(mxu_dtype)              # (128, 128)
    b1_r = jnp.tile(jnp.asarray(b1, jnp.float32), PACK).reshape(1, OUT_LANES)
    b2_r = jnp.tile(jnp.asarray(b2, jnp.float32), PACK).reshape(1, OUT_LANES)

    x = jnp.asarray(x, jnp.float32)
    aligned = (B % PACK == 0)
    if aligned:
        b_run = B
        x_run = x                                              # no pad, no copy
    else:
        # Ragged batch: pad only the <32-row tail so packing is possible.
        b_run = _round_up(B, PACK)
        x_run = jnp.pad(x, ((0, b_run - B), (0, 0)))
    rows = b_run // PACK
    x_packed = x_run.reshape(rows, IN_LANES)                   # free contiguous reshape
    if x_packed.dtype != io_dtype:
        x_packed = x_packed.astype(io_dtype)

    # Tile selection: bounded padding (<8 packed rows per tile) and >=2 grid
    # steps for mid/large batches so v7x's two TensorCores both get work.
    num_tiles = pl.cdiv(rows, block_rows)
    if num_tiles == 1 and rows >= 16:
        num_tiles = 2
    tr = min(block_rows, _round_up(pl.cdiv(rows, num_tiles), 8))
    if tr >= rows:
        tr = rows                                              # single full block
    grid = (pl.cdiv(rows, tr),)

    flops = 2 * rows * (IN_LANES * OUT_LANES + OUT_LANES * OUT_LANES)
    bytes_accessed = (x_packed.size * x_packed.dtype.itemsize
                      + rows * OUT_LANES * io_dtype.itemsize
                      + w1_bd.size * w1_bd.dtype.itemsize
                      + w2_bd.size * w2_bd.dtype.itemsize
                      + (b1_r.size + b2_r.size) * 4)

    out_packed = pl.pallas_call(
        mlp_kernel,
        out_shape=jax.ShapeDtypeStruct((rows, OUT_LANES), io_dtype),
        grid=grid,
        in_specs=[
            pl.BlockSpec((tr, IN_LANES), lambda i: (i, 0)),          # x tile (pipelined)
            pl.BlockSpec((IN_LANES, OUT_LANES), lambda i: (0, 0)),   # resident W1 block-diag
            pl.BlockSpec((1, OUT_LANES), lambda i: (0, 0)),          # resident b1
            pl.BlockSpec((OUT_LANES, OUT_LANES), lambda i: (0, 0)),  # resident W2 block-diag
            pl.BlockSpec((1, OUT_LANES), lambda i: (0, 0)),          # resident b2
        ],
        out_specs=pl.BlockSpec((tr, OUT_LANES), lambda i: (i, 0)),   # lane-dense output
        compiler_params=pltpu.CompilerParams(
            dimension_semantics=("parallel",),    # megacore sharding on v7x; no-op elsewhere
            vmem_limit_bytes=32 * 1024 * 1024,    # headroom; well under v7x's 64 MiB physical
        ),
        cost_estimate=pl.CostEstimate(flops=int(flops), transcendentals=0,
                                      bytes_accessed=int(bytes_accessed)),
    )(x_packed, w1_bd, b1_r, w2_bd, b2_r)

    # Unpack: (rows, 128) -> (b_run, 4) is a free contiguous reshape.
    out = out_packed.reshape(b_run, OUT_F)
    if not aligned:
        out = out[:B]          # only ragged batches pay for this slice
    return out


def _reference(x, w1, b1, w2, b2):
    h = jnp.maximum(x @ w1.T + b1, 0.0)
    return h @ w2.T + b2


if __name__ == "__main__":
    key = jax.random.PRNGKey(0)
    k_w, k_b1, k_b2, k_x1, k_x2, k_x3 = jax.random.split(key, 6)

    # Deterministic flat weight vector of length 28 (12 for fc1, 16 for fc2),
    # mirroring NeuralNet.__init__'s slicing of `weights`.
    weights = jax.random.normal(k_w, (28,), dtype=jnp.float32)
    w1 = weights[:12].reshape(4, 3)      # fc1.weight (out=4, in=3)
    w2 = weights[12:28].reshape(4, 4)    # fc2.weight (out=4, in=4)

    # Biases: the PyTorch module keeps Linear's default-initialized biases
    # (only .weight is overwritten); initialize them deterministically here.
    b1 = jax.random.uniform(k_b1, (4,), jnp.float32, minval=-0.5, maxval=0.5)
    b2 = jax.random.uniform(k_b2, (4,), jnp.float32, minval=-0.5, maxval=0.5)

    # Tolerance depends on whether the MXU operands run in bf16 (forced on v5e).
    if _matmul_dtype(jnp.float32) == jnp.float32:
        atol, rtol = 1e-5, 1e-5
    else:
        atol, rtol = 3e-1, 1e-1

    # 1) Tiny ragged batch (B=8, not a multiple of 32): tail-pad fallback path.
    x1 = jax.random.normal(k_x1, (8, 3), dtype=jnp.float32)
    o1 = jax.block_until_ready(neural_net_forward(x1, w1, b1, w2, b2))
    r1 = _reference(x1, w1, b1, w2, b2)
    assert o1.shape == (8, 4)
    assert jnp.allclose(o1, r1, atol=atol, rtol=rtol)

    # 2) Aligned batch: no-pad/no-slice fast path, multi-step pipelined grid.
    x2 = jax.random.normal(k_x2, (2048, 3), dtype=jnp.float32)
    o2 = jax.block_until_ready(
        neural_net_forward(x2, w1, b1, w2, b2, block_rows=16))
    r2 = _reference(x2, w1, b1, w2, b2)
    assert o2.shape == (2048, 4)
    assert jnp.allclose(o2, r2, atol=atol, rtol=rtol)

    # 3) Aligned batch whose packed-row count (33) is not divisible by the tile:
    #    exercises the masked partial edge block (no host-side padding).
    x3 = jax.random.normal(k_x3, (33 * PACK, 3), dtype=jnp.float32)
    o3 = jax.block_until_ready(neural_net_forward(x3, w1, b1, w2, b2))
    r3 = _reference(x3, w1, b1, w2, b2)
    assert o3.shape == (33 * PACK, 4)
    assert jnp.allclose(o3, r3, atol=atol, rtol=rtol)

    # 4) Opt-in bf16 streaming (halves HBM bytes); documented looser tolerance.
    o4 = jax.block_until_ready(
        neural_net_forward(x2, w1, b1, w2, b2, io_dtype=jnp.bfloat16))
    assert jnp.allclose(o4.astype(jnp.float32), r2, atol=3e-1, rtol=1e-1)

    print("KERNEL_OK")
</pallas_src>

<mosaic_0001>
module attributes {stable_mosaic.version = 11 : i64} {
  func.func @mlp_kernel(%arg0: i32, %arg1: memref<1x96xf32, #tpu.memory_space<vmem>>, %arg2: memref<96x128xf32, #tpu.memory_space<vmem>>, %arg3: memref<1x128xf32, #tpu.memory_space<vmem>>, %arg4: memref<128x128xf32, #tpu.memory_space<vmem>>, %arg5: memref<1x128xf32, #tpu.memory_space<vmem>>, %arg6: memref<1x128xf32, #tpu.memory_space<vmem>>) attributes {dimension_semantics = [#tpu.dimension_semantics<parallel>], iteration_bounds = array<i64: 1>, scalar_prefetch = 0 : i64, scratch_operands = 0 : i64, tpu.core_type = #tpu.core_type<tc>, window_params = [{transform_indices = @transform_0, window_bounds = array<i64: 1, 96>}, {pipeline_mode = #tpu.pipeline_mode<synchronous>, transform_indices = @transform_1, window_bounds = array<i64: 96, 128>}, {pipeline_mode = #tpu.pipeline_mode<synchronous>, transform_indices = @transform_2, window_bounds = array<i64: 1, 128>}, {pipeline_mode = #tpu.pipeline_mode<synchronous>, transform_indices = @transform_3, window_bounds = array<i64: 128, 128>}, {pipeline_mode = #tpu.pipeline_mode<synchronous>, transform_indices = @transform_4, window_bounds = array<i64: 1, 128>}, {transform_indices = @transform_5, window_bounds = array<i64: 1, 128>}]} {
    %c0 = arith.constant 0 : index
    %c0_0 = arith.constant 0 : index
    %0 = vector.load %arg1[%c0, %c0_0] : memref<1x96xf32, #tpu.memory_space<vmem>>, vector<1x96xf32>
    %c0_1 = arith.constant 0 : index
    %c0_2 = arith.constant 0 : index
    %1 = vector.load %arg2[%c0_1, %c0_2] : memref<96x128xf32, #tpu.memory_space<vmem>>, vector<96x128xf32>
    %cst = arith.constant dense<0.000000e+00> : vector<1x128xf32>
    %2 = tpu.matmul %0, %1, %cst {dimension_numbers = #tpu.dot_dimension_numbers<[1], [0], [0], [1], [0, 0, 1, 1], [], []>} : vector<1x96xf32>, vector<96x128xf32>, vector<1x128xf32> -> vector<1x128xf32>
    %c0_3 = arith.constant 0 : index
    %c0_4 = arith.constant 0 : index
    %3 = vector.load %arg3[%c0_3, %c0_4] : memref<1x128xf32, #tpu.memory_space<vmem>>, vector<1x128xf32>
    %4 = arith.addf %2, %3 : vector<1x128xf32>
    %cst_5 = arith.constant 0.000000e+00 : f32
    %5 = vector.broadcast %cst_5 : f32 to vector<1x128xf32>
    %6 = arith.maximumf %4, %5 : vector<1x128xf32>
    %c0_6 = arith.constant 0 : index
    %c0_7 = arith.constant 0 : index
    %7 = vector.load %arg4[%c0_6, %c0_7] : memref<128x128xf32, #tpu.memory_space<vmem>>, vector<128x128xf32>
    %cst_8 = arith.constant dense<0.000000e+00> : vector<1x128xf32>
    %8 = tpu.matmul %6, %7, %cst_8 {dimension_numbers = #tpu.dot_dimension_numbers<[1], [0], [0], [1], [0, 0, 1, 1], [], []>} : vector<1x128xf32>, vector<128x128xf32>, vector<1x128xf32> -> vector<1x128xf32>
    %c0_9 = arith.constant 0 : index
    %c0_10 = arith.constant 0 : index
    %9 = vector.load %arg5[%c0_9, %c0_10] : memref<1x128xf32, #tpu.memory_space<vmem>>, vector<1x128xf32>
    %10 = arith.addf %8, %9 : vector<1x128xf32>
    %c0_11 = arith.constant 0 : index
    %c0_12 = arith.constant 0 : index
    %11 = vector.load %arg6[%c0_11, %c0_12] : memref<1x128xf32, #tpu.memory_space<vmem>>, vector<1x128xf32>
    tpu.vector_store %arg6[%c0_11, %c0_12], %10 {strides = array<i32>} : memref<1x128xf32, #tpu.memory_space<vmem>>, vector<1x128xf32>,
    return
  }
  func.func @transform_0(%arg0: i32) -> (i32, i32) {
    %c0_i32 = arith.constant 0 : i32
    %c0_i32_0 = arith.constant 0 : i32
    return %arg0, %c0_i32 : i32, i32
  }
  func.func @transform_1(%arg0: i32) -> (i32, i32) {
    %c0_i32 = arith.constant 0 : i32
    %c0_i32_0 = arith.constant 0 : i32
    %c0_i32_1 = arith.constant 0 : i32
    return %c0_i32, %c0_i32_0 : i32, i32
  }
  func.func @transform_2(%arg0: i32) -> (i32, i32) {
    %c0_i32 = arith.constant 0 : i32
    %c0_i32_0 = arith.constant 0 : i32
    %c0_i32_1 = arith.constant 0 : i32
    return %c0_i32, %c0_i32_0 : i32, i32
  }
  func.func @transform_3(%arg0: i32) -> (i32, i32) {
    %c0_i32 = arith.constant 0 : i32
    %c0_i32_0 = arith.constant 0 : i32
    %c0_i32_1 = arith.constant 0 : i32
    return %c0_i32, %c0_i32_0 : i32, i32
  }
  func.func @transform_4(%arg0: i32) -> (i32, i32) {
    %c0_i32 = arith.constant 0 : i32
    %c0_i32_0 = arith.constant 0 : i32
    %c0_i32_1 = arith.constant 0 : i32
    return %c0_i32, %c0_i32_0 : i32, i32
  }
  func.func @transform_5(%arg0: i32) -> (i32, i32) {
    %c0_i32 = arith.constant 0 : i32
    %c0_i32_0 = arith.constant 0 : i32
    return %arg0, %c0_i32 : i32, i32
  }
}

</mosaic_0001>

<bundles_post_ra>
// kernel: tpu_custom_call.1
= control target key start
LH: loop header
LB: loop body
LE: loop exit
PB: predicated region body
PF: predicated region fallthrough
CT: control target
= control target key end

     0   :  { %10 = vsyncpa [#allocation3], 0  ;;  %s324_s0 = inlined_call_operand.hbm [shape: f32[1,96], index: 0, kind: input, shape index: {}]   ;;  %s325_s1 = inlined_call_operand.hbm [shape: f32[96,128], index: 1, kind: input, shape index: {}]   ;;  %s326_s2 = inlined_call_operand.vmem [shape: f32[1,128], index: 2, kind: input, shape index: {}]   ;;  %s327_s3 = inlined_call_operand.hbm [shape: f32[128,128], index: 3, kind: input, shape index: {}]   ;;  %s328_s4 = inlined_call_operand.vmem [shape: f32[1,128], index: 4, kind: input, shape index: {}]   ;;  %s329_s5 = inlined_call_operand.hbm [shape: f32[1,128], index: 5, kind: output, shape index: {}]  }
   0x1   :  { %11 = vsyncpa [#allocation6], 0  ;;  %s28_s20 = sshll.u32 %s325_s1, 4  ;;  %s29_s20 = int_to_ptr.hbm [resolvable:$true] %s28_s20 }
   0x2   :  { %12 = vsyncpa [#allocation4], 0  ;;  %s270_s21 = smov [#allocation5]   ;;  %s18_s25 = sshll.u32 %s324_s0, 4  ;;  %s19_s25 = int_to_ptr.hbm [resolvable:$true] %s18_s25 }
   0x3   :  { %s30_s22 = sshll.u32 %s270_s21, 4  ;;  %s271_s26 = smov 128   ;;  %s31_s22 = int_to_ptr.vmem [resolvable:$true] %s30_s22 }
   0x4   :  { %s272_s27 = smov 8   ;;  %s273_s28 = smov [#allocation2]  }
   0x5   :  { %36 = dma.hbm_to_vmem [thread:$0]  %s29_s20, 1536, %s31_s22, [#allocation6], %s271_s26, %s271_s26, %s272_s27  }
   0x6   :  { %s20_s29 = sshll.u32 %s273_s28, 4  ;;  %s43_s7 = sshll.u32 %s327_s3, 4  ;;  %s21_s29 = int_to_ptr.vmem [resolvable:$true] %s20_s29  ;;  %s44_s7 = int_to_ptr.hbm [resolvable:$true] %s43_s7 }
   0x7   :  { %23 = dma.hbm_to_vmem [thread:$0]  %s19_s25, 16, %s21_s29, [#allocation3]  }
   0x8   :  { %s274_s1 = smov [#allocation7]  }
   0x9   :  { %s45_s8 = sshll.u32 %s274_s1, 4  ;;  %s46_s8 = int_to_ptr.vmem [resolvable:$true] %s45_s8 }
   0xa   :  { %51 = dma.hbm_to_vmem [thread:$0]  %s44_s7, 2048, %s46_s8, [#allocation6], %s271_s26, %s271_s26, %s272_s27  }
   0xb   :  { %264 = dma.done.wait [#allocation3], 16  }
   0xc   :  { %265 = vsyncadd [#allocation3], 4294967280 }
   0xd   :  { %266 = dma.done.wait [#allocation6], 3584  }
   0xe   :  { %267 = vsyncadd [#allocation6], 4294963712  ;;  %v78_v0 = vld [vmem:[#allocation5 + $0x58] sm:$0xff]  ;;  %v77_v1 = vld [vmem:[#allocation5 + $0x50] sm:$0xff]  ;;  %vm80_vm0 = vcmask 785408   ;;  %s275_s11 = smov [#allocation8]  }
   0xf   :  { %88 = vmatpush.msra.mxu0 %v78_v0  ;;  %v76_v2 = vld [vmem:[#allocation5 + $0x48] sm:$0xff]  ;;  %v75_v3 = vld [vmem:[#allocation5 + $0x40] sm:$0xff]  ;;  %v120_v4 = vld [vmem:[#allocation7 + $0x78] sm:$0xff]  ;;  %s148_s12 = sshll.u32 %s275_s11, 4  ;;  %s150_s15 = sshll.u32 %s329_s5, 4  ;;  %s149_s12 = int_to_ptr.vmem [resolvable:$true] %s148_s12  ;;  %s151_s15 = int_to_ptr.hbm [resolvable:$true] %s150_s15 }
  0x10   :  { %v119_v5 = vld [vmem:[#allocation7 + $0x70] sm:$0xff]  ;;  %122 = vmatpush.msra.mxu1 %v120_v4  ;;  %v74_v6 = vld [vmem:[#allocation5 + $0x38] sm:$0xff]  ;;  %v118_v7 = vld [vmem:[#allocation7 + $0x68] sm:$0xff] }
  0x11   :  { %89 = vmatpush.msra.mxu0 %v77_v1  ;;  %v73_v8 = vld [vmem:[#allocation5 + $0x30] sm:$0xff]  ;;  %v117_v9 = vld [vmem:[#allocation7 + $0x60] sm:$0xff]  ;;  %v72_v10 = vld [vmem:[#allocation5 + $0x28] sm:$0xff] }
  0x12   :  { %123 = vmatpush.msra.mxu1 %v119_v5  ;;  %v116_v11 = vld [vmem:[#allocation7 + $0x58] sm:$0xff]  ;;  %v71_v12 = vld [vmem:[#allocation5 + $0x20] sm:$0xff]  ;;  %v115_v13 = vld [vmem:[#allocation7 + $0x50] sm:$0xff] }
  0x13   :  { %90 = vmatpush.msra.mxu0 %v76_v2  ;;  %v70_v14 = vld [vmem:[#allocation5 + $0x18] sm:$0xff]  ;;  %v114_v15 = vld [vmem:[#allocation7 + $0x48] sm:$0xff]  ;;  %v69_v16 = vld [vmem:[#allocation5 + $0x10] sm:$0xff] }
  0x14   :  { %124 = vmatpush.msra.mxu1 %v118_v7  ;;  %v113_v17 = vld [vmem:[#allocation7 + $0x40] sm:$0xff]  ;;  %v68_v18 = vld [vmem:[#allocation5 + $0x8] sm:$0xff]  ;;  %v112_v19 = vld [vmem:[#allocation7 + $0x38] sm:$0xff] }
  0x15   :  { %91 = vmatpush.msra.mxu0 %v75_v3  ;;  %v67_v20 = vld [vmem:[#allocation5] sm:$0xff]  ;;  %v111_v21 = vld [vmem:[#allocation7 + $0x30] sm:$0xff]  ;;  %v66_v22 = vld [vmem:[#allocation2] sm:$0x1] }
  0x16   :  { %125 = vmatpush.msra.mxu1 %v117_v9  ;;  %v110_v23 = vld [vmem:[#allocation7 + $0x28] sm:$0xff]  ;;  %v109_v24 = vld [vmem:[#allocation7 + $0x20] sm:$0xff]  ;;  %v108_v25 = vld [vmem:[#allocation7 + $0x18] sm:$0xff] }
  0x17   :  { %92 = vmatpush.msra.mxu0 %v74_v6  ;;  %v107_v26 = vld [vmem:[#allocation7 + $0x10] sm:$0xff]  ;;  %v106_v27 = vld [vmem:[#allocation7 + $0x8] sm:$0xff]  ;;  %v105_v28 = vld [vmem:[#allocation7] sm:$0xff] }
  0x18   :  { %126 = vmatpush.msra.mxu1 %v116_v11  ;;  %v79_v29 = vld [vmem:[%s326_s2] sm:$0x1] }
  0x19   :  { %93 = vmatpush.msra.mxu0 %v73_v8  ;;  %v121_v33 = vld [vmem:[%s328_s4] sm:$0x1] }
  0x1a   :  { %127 = vmatpush.msra.mxu1 %v115_v13 }
  0x1b   :  { %94 = vmatpush.msra.mxu0 %v72_v10 }
  0x1c   :  { %128 = vmatpush.msra.mxu1 %v114_v15 }
  0x1d   :  { %95 = vmatpush.msra.mxu0 %v71_v12 }
  0x1e   :  { %129 = vmatpush.msra.mxu1 %v113_v17 }
  0x1f   :  { %96 = vmatpush.msra.mxu0 %v70_v14 }
  0x20   :  { %130 = vmatpush.msra.mxu1 %v112_v19 }
  0x21   :  { %97 = vmatpush.msra.mxu0 %v69_v16 }
  0x22   :  { %131 = vmatpush.msra.mxu1 %v111_v21 }
  0x23   :  { %98 = vmatpush.msra.mxu0 %v68_v18 }
  0x24   :  { %132 = vmatpush.msra.mxu1 %v110_v23 }
  0x25   :  { %99 = vmatpush.msra.mxu0 %v67_v20 }
  0x26   :  { %161 = vmatmul.msk.f32.vlgmr.msra.gmra.mxu0 %vm80_vm0, %v66_v22  ;;  %133 = vmatpush.msra.mxu1 %v109_v24 }
  0x28   :  { %134 = vmatpush.msra.mxu1 %v108_v25 }
  0x2a   :  { %135 = vmatpush.msra.mxu1 %v107_v26 }
  0x2c   :  { %136 = vmatpush.msra.mxu1 %v106_v27 }
  0x2e   :  { %137 = vmatpush.msra.mxu1 %v105_v28 }
  0xa3   :  { %v101_v30 = vpop.f32.mrf.mxu0 }
  0xa4   :  { %v102_v31 = vadd.f32 %v101_v30, %v79_v29 }
  0xa6   :  { %v104_v32 = vmax.f32 %v102_v31, 0.0 }
  0xa8   :  { %138 = vmatmul.f32.vlgmr.msra.gmra.mxu1 %v104_v32 }
 0x125   :  { %v139_v34 = vpop.f32.mrf.mxu1 }
 0x126   :  { %v140_v35 = vadd.f32 %v139_v34, %v121_v33 }
 0x128   :  { %142 = vst [vmem:[#allocation8] sm:$0x1] %v140_v35 }
 0x129   :  { %153 = dma.vmem_to_hbm [thread:$0]  %s149_s12, 16, %s151_s15, [#allocation4]  }
 0x12a   :  { %268 = dma.done.wait [#allocation4], 16  }
 0x12b   :  { %269 = vsyncadd [#allocation4], 4294967280 }
 0x12c   :  { %158 = vsyncpa [#allocation3], 1 }
 0x12d   :  { %159 = vsyncpa [#allocation6], 1 }
 0x12e   :  { %160 = vsyncpa [#allocation4], 1 }

</bundles_post_ra>
